<compile_context>
chip_gen: v7x
topology: tpu7x:2x2x1
jax: 0.10.0
libtpu: 0.0.40
codegen_flags: <defaults>
</compile_context>

<pallas_src>
import jax
import jax.numpy as jnp
from jax.experimental import pallas as pl
from jax.experimental.pallas import tpu as pltpu

D_CONST = float(2 ** 8)  # self.d
_BLOCK_BYTES_BUDGET = 3 * 1024 * 1024  # ~3 MiB of input per grid step


def _variant_a_kernel(w_ref, b_ref, s_ref, x_ref, out_ref):
    # w_ref: SMEM (9,)   3x3 conv weights, already scaled by 1/d
    # b_ref: SMEM (1,)   conv bias (unscaled)
    # s_ref: SMEM (1,)   output scale = d * alpha
    # x_ref: VMEM (TN, H, W)  original (unscaled, unpadded) input tile
    # out_ref: VMEM (TN, H, W)
    TN, H, W = out_ref.shape
    x = x_ref[...]                                   # conv source AND residual (f32)

    # ---- Column (lane) reflected taps of x: 2 XLU rolls + 2 selects. ----
    col = jax.lax.broadcasted_iota(jnp.int32, (1, 1, W), 2)
    at_left = col == 0
    at_right = col == (W - 1)
    r_right = pltpu.roll(x, shift=1, axis=2)         # out[j] = x[j-1] (wraps at 0)
    r_left = pltpu.roll(x, shift=W - 1, axis=2)      # out[j] = x[j+1] (wraps at W-1)
    c_m1 = jnp.where(at_left, r_left, r_right)       # x[:, :, refl(j-1)]
    c_p1 = jnp.where(at_right, r_right, r_left)      # x[:, :, refl(j+1)]

    # ---- Horizontal partials per kernel row (commuted 3x3). ----
    hT = w_ref[0] * c_m1 + w_ref[1] * x + w_ref[2] * c_p1
    hM = w_ref[3] * c_m1 + w_ref[4] * x + w_ref[5] * c_p1
    hB = w_ref[6] * c_m1 + w_ref[7] * x + w_ref[8] * c_p1

    # ---- Row (sublane) reflected shifts applied only to hT / hB. ----
    row = jax.lax.broadcasted_iota(jnp.int32, (1, H, 1), 1)
    # top[i] = hT[refl(i-1)] ; bot[i] = hB[refl(i+1)]
    top = jnp.where(row == 0, hT[:, 1:2, :], pltpu.roll(hT, shift=1, axis=1))
    bot = jnp.where(row == H - 1, hB[:, H - 2:H - 1, :],
                    pltpu.roll(hB, shift=H - 1, axis=1))

    acc = top + hM + bot + b_ref[0]
    out_ref[...] = (jnp.tanh(acc) * s_ref[0] + x).astype(out_ref.dtype)


def _tpu_generation_hints():
    """Returns (vmem_limit_bytes, num_tensorcores_per_chip), conservative off-TPU."""
    vmem = None
    try:
        info = pltpu.get_tpu_info()
        for name in ("vmem_capacity_bytes", "vmem_size_bytes", "vmem_bytes"):
            v = getattr(info, name, None)
            if v:
                vmem = int(v)
                break
    except Exception:
        vmem = None
    if vmem is None:
        vmem = 128 * 1024 * 1024
    # v7x-like: 64 MiB VMEM per TC and 2 TCs per chip; v5e/v6e: 128 MiB, 1 TC.
    is_v7x_like = vmem <= 64 * 1024 * 1024
    vmem_limit = (48 if is_v7x_like else 64) * 1024 * 1024
    return vmem_limit, (2 if is_v7x_like else 1)


def _pick_block_n(N, H, W, num_tc):
    """Batch-tile size: ~3 MiB of input per block; split across TCs only on v7x."""
    img_bytes = H * W * 4
    bn = max(1, min(N, _BLOCK_BYTES_BUDGET // max(img_bytes, 1)))
    # Only v7x-like parts (2 TCs) benefit from >= 2 "parallel" grid steps, and
    # only once there is enough total data to amortize the extra step overhead.
    if num_tc >= 2 and N >= 2 and N * img_bytes >= 2 * 1024 * 1024:
        bn = max(1, min(bn, N // num_tc))
    while N % bn:
        bn -= 1
    return bn


def variant_a_forward(x_nchw, weight, bias, alpha, *, block_n=None):
    """x_nchw: (N, 1, H, W) float32. weight: (1,1,3,3). bias: (1,). alpha: (1,)."""
    N, C, H, W = x_nchw.shape
    assert C == 1, "Variant_A conv_0 has in_channels=1"
    assert H >= 2 and W >= 2, "ReflectionPad2d(1) needs H, W >= 2"

    x = x_nchw[:, 0, :, :].astype(jnp.float32)                 # (N, H, W)

    # Lane-dense stores: pad W up to a multiple of 128.  The first pad column
    # carries the reflected column x[:, :, W-2] so the in-kernel right-edge
    # reflection at column W-1 stays exact; pad columns are sliced off below.
    Wp = ((W + 127) // 128) * 128
    if Wp != W:
        refl_col = x[:, :, W - 2:W - 1]
        pad_rest = jnp.zeros((N, H, Wp - W - 1), dtype=x.dtype)
        x_in = jnp.concatenate([x, refl_col, pad_rest], axis=2)
    else:
        x_in = x

    vmem_limit, num_tc = _tpu_generation_hints()
    bn = _pick_block_n(N, H, Wp, num_tc) if block_n is None else block_n
    assert N % bn == 0

    # Fold 1/d into the weights (exact: d is a power of two) and d*alpha into a
    # single scale; the residual is then read unscaled from the same tile.
    w_scaled = (weight.reshape(9) / D_CONST).astype(jnp.float32)
    b = bias.reshape(1).astype(jnp.float32)
    scale = (alpha.reshape(1) * D_CONST).astype(jnp.float32)

    # TODO(synk): add an H-tile grid axis with a 1-row halo for frames whose
    # whole (H, Wp) plane exceeds the per-block VMEM budget (matters on v7x's
    # 64 MiB VMEM for e.g. 2160x3840 f32 frames); not needed at these shapes.
    out = pl.pallas_call(
        _variant_a_kernel,
        out_shape=jax.ShapeDtypeStruct((N, H, Wp), x_in.dtype),
        grid_spec=pltpu.PrefetchScalarGridSpec(
            num_scalar_prefetch=0,
            grid=(N // bn,),
            in_specs=[
                pl.BlockSpec(memory_space=pltpu.MemorySpace.SMEM),   # weights (1/d folded)
                pl.BlockSpec(memory_space=pltpu.MemorySpace.SMEM),   # bias
                pl.BlockSpec(memory_space=pltpu.MemorySpace.SMEM),   # scale = d*alpha
                pl.BlockSpec((bn, H, Wp), lambda n: (n, 0, 0)),      # x — single HBM stream
            ],
            out_specs=pl.BlockSpec((bn, H, Wp), lambda n: (n, 0, 0)),
        ),
        compiler_params=pltpu.CompilerParams(
            dimension_semantics=("parallel",),
            vmem_limit_bytes=vmem_limit,
        ),
    )(w_scaled, b, scale, x_in)

    if Wp != W:
        out = out[:, :, :W]
    return out[:, None, :, :]                                   # back to NCHW


def _reference(x_nchw, weight, bias, alpha):
    """Pure-JAX reference of the PyTorch forward (for validation)."""
    x = x_nchw
    xd = x / D_CONST
    xp = jnp.pad(xd, ((0, 0), (0, 0), (1, 1), (1, 1)), mode="reflect")
    out = jax.lax.conv_general_dilated(
        xp, weight, window_strides=(1, 1), padding="VALID",
        dimension_numbers=("NCHW", "OIHW", "NCHW"))
    out = out + bias.reshape(1, 1, 1, 1)
    out = jnp.tanh(out) * D_CONST * alpha.reshape(1, 1, 1, 1)
    return out + x


def _check(x, weight, bias, alpha, **kw):
    out = jax.block_until_ready(variant_a_forward(x, weight, bias, alpha, **kw))
    ref = _reference(x, weight, bias, alpha)
    assert out.shape == x.shape, (out.shape, x.shape)
    assert jnp.allclose(out, ref, atol=1e-4, rtol=1e-4), "mismatch vs reference"
    return out


if __name__ == "__main__":
    key = jax.random.PRNGKey(0)
    k_x, k_w, k_b, k_x2, k_x3 = jax.random.split(key, 5)

    # Deterministic synthetic parameters (shapes from the module __init__).
    weight = jax.random.normal(k_w, (1, 1, 3, 3), dtype=jnp.float32) * 0.1
    bias = jax.random.normal(k_b, (1,), dtype=jnp.float32) * 0.1
    alpha = jnp.array([0.1], dtype=jnp.float32)

    # 1) Lane-dense case (W already a multiple of 128).
    x1 = jax.random.normal(k_x, (2, 1, 16, 128), dtype=jnp.float32)
    _check(x1, weight, bias, alpha)

    # 2) Non-multiple-of-128 width exercises the wrapper's lane pad + exact
    #    right-edge reflection column.
    x2 = jax.random.normal(k_x2, (2, 1, 16, 96), dtype=jnp.float32)
    _check(x2, weight, bias, alpha)

    # 3) Multi-step grid (explicit block_n) exercises the batch tiling path.
    x3 = jax.random.normal(k_x3, (4, 1, 16, 128), dtype=jnp.float32)
    _check(x3, weight, bias, alpha, block_n=2)

    print("KERNEL_OK")
</pallas_src>

<mosaic_0001>
module attributes {stable_mosaic.version = 11 : i64} {
  func.func @_variant_a_kernel(%arg0: i32, %arg1: memref<9xf32, #tpu.memory_space<smem>>, %arg2: memref<1xf32, #tpu.memory_space<smem>>, %arg3: memref<1xf32, #tpu.memory_space<smem>>, %arg4: memref<2x16x128xf32, #tpu.memory_space<vmem>>, %arg5: memref<2x16x128xf32, #tpu.memory_space<vmem>>) attributes {dimension_semantics = [#tpu.dimension_semantics<parallel>], iteration_bounds = array<i64: 1>, scalar_prefetch = 0 : i64, scratch_operands = 0 : i64, tpu.core_type = #tpu.core_type<tc>, window_params = [{transform_indices = @transform_0, window_bounds = array<i64: 9>}, {transform_indices = @transform_1, window_bounds = array<i64: 1>}, {transform_indices = @transform_2, window_bounds = array<i64: 1>}, {transform_indices = @transform_3, window_bounds = array<i64: 2, 16, 128>}, {transform_indices = @transform_4, window_bounds = array<i64: 2, 16, 128>}]} {
    %c0 = arith.constant 0 : index
    %c0_0 = arith.constant 0 : index
    %c0_1 = arith.constant 0 : index
    %0 = vector.load %arg4[%c0, %c0_0, %c0_1] : memref<2x16x128xf32, #tpu.memory_space<vmem>>, vector<2x16x128xf32>
    %1 = tpu.iota {dimensions = array<i32: 2>} : vector<1x1x128xi32>
    %c0_i32 = arith.constant 0 : i32
    %2 = vector.broadcast %c0_i32 : i32 to vector<1x1x128xi32>
    %3 = arith.cmpi eq, %1, %2 : vector<1x1x128xi32>
    %c127_i32 = arith.constant 127 : i32
    %4 = vector.broadcast %c127_i32 : i32 to vector<1x1x128xi32>
    %5 = arith.cmpi eq, %1, %4 : vector<1x1x128xi32>
    %c1_i32 = arith.constant 1 : i32
    %6 = tpu.dynamic_rotate %0 by %c1_i32 dim 2 : vector<2x16x128xf32>, i32 -> vector<2x16x128xf32>
    %c127_i32_2 = arith.constant 127 : i32
    %7 = tpu.dynamic_rotate %0 by %c127_i32_2 dim 2 : vector<2x16x128xf32>, i32 -> vector<2x16x128xf32>
    %8 = vector.shape_cast %3 : vector<1x1x128xi1> to vector<1x1x128xi1>
    %9 = vector.broadcast %8 : vector<1x1x128xi1> to vector<2x16x128xi1>
    %10 = arith.select %9, %7, %6 : vector<2x16x128xi1>, vector<2x16x128xf32>
    %11 = vector.shape_cast %5 : vector<1x1x128xi1> to vector<1x1x128xi1>
    %12 = vector.broadcast %11 : vector<1x1x128xi1> to vector<2x16x128xi1>
    %13 = arith.select %12, %6, %7 : vector<2x16x128xi1>, vector<2x16x128xf32>
    %c0_3 = arith.constant 0 : index
    %14 = memref.load %arg1[%c0_3] : memref<9xf32, #tpu.memory_space<smem>>
    %15 = vector.broadcast %14 : f32 to vector<2x16x128xf32>
    %16 = arith.mulf %15, %10 : vector<2x16x128xf32>
    %c1 = arith.constant 1 : index
    %17 = memref.load %arg1[%c1] : memref<9xf32, #tpu.memory_space<smem>>
    %18 = vector.broadcast %17 : f32 to vector<2x16x128xf32>
    %19 = arith.mulf %18, %0 : vector<2x16x128xf32>
    %20 = arith.addf %16, %19 : vector<2x16x128xf32>
    %c2 = arith.constant 2 : index
    %21 = memref.load %arg1[%c2] : memref<9xf32, #tpu.memory_space<smem>>
    %22 = vector.broadcast %21 : f32 to vector<2x16x128xf32>
    %23 = arith.mulf %22, %13 : vector<2x16x128xf32>
    %24 = arith.addf %20, %23 : vector<2x16x128xf32>
    %c3 = arith.constant 3 : index
    %25 = memref.load %arg1[%c3] : memref<9xf32, #tpu.memory_space<smem>>
    %26 = vector.broadcast %25 : f32 to vector<2x16x128xf32>
    %27 = arith.mulf %26, %10 : vector<2x16x128xf32>
    %c4 = arith.constant 4 : index
    %28 = memref.load %arg1[%c4] : memref<9xf32, #tpu.memory_space<smem>>
    %29 = vector.broadcast %28 : f32 to vector<2x16x128xf32>
    %30 = arith.mulf %29, %0 : vector<2x16x128xf32>
    %31 = arith.addf %27, %30 : vector<2x16x128xf32>
    %c5 = arith.constant 5 : index
    %32 = memref.load %arg1[%c5] : memref<9xf32, #tpu.memory_space<smem>>
    %33 = vector.broadcast %32 : f32 to vector<2x16x128xf32>
    %34 = arith.mulf %33, %13 : vector<2x16x128xf32>
    %35 = arith.addf %31, %34 : vector<2x16x128xf32>
    %c6 = arith.constant 6 : index
    %36 = memref.load %arg1[%c6] : memref<9xf32, #tpu.memory_space<smem>>
    %37 = vector.broadcast %36 : f32 to vector<2x16x128xf32>
    %38 = arith.mulf %37, %10 : vector<2x16x128xf32>
    %c7 = arith.constant 7 : index
    %39 = memref.load %arg1[%c7] : memref<9xf32, #tpu.memory_space<smem>>
    %40 = vector.broadcast %39 : f32 to vector<2x16x128xf32>
    %41 = arith.mulf %40, %0 : vector<2x16x128xf32>
    %42 = arith.addf %38, %41 : vector<2x16x128xf32>
    %c8 = arith.constant 8 : index
    %43 = memref.load %arg1[%c8] : memref<9xf32, #tpu.memory_space<smem>>
    %44 = vector.broadcast %43 : f32 to vector<2x16x128xf32>
    %45 = arith.mulf %44, %13 : vector<2x16x128xf32>
    %46 = arith.addf %42, %45 : vector<2x16x128xf32>
    %47 = tpu.iota {dimensions = array<i32: 1>} : vector<1x16x1xi32>
    %c0_i32_4 = arith.constant 0 : i32
    %48 = vector.broadcast %c0_i32_4 : i32 to vector<1x16x1xi32>
    %49 = arith.cmpi eq, %47, %48 : vector<1x16x1xi32>
    %50 = vector.extract_strided_slice %24 {offsets = [0, 1, 0], sizes = [2, 1, 128], strides = [1, 1, 1]} : vector<2x16x128xf32> to vector<2x1x128xf32>
    %c1_i32_5 = arith.constant 1 : i32
    %51 = tpu.dynamic_rotate %24 by %c1_i32_5 dim 1 : vector<2x16x128xf32>, i32 -> vector<2x16x128xf32>
    %52 = vector.shape_cast %49 : vector<1x16x1xi1> to vector<1x16x1xi1>
    %53 = vector.broadcast %52 : vector<1x16x1xi1> to vector<2x16x128xi1>
    %54 = vector.shape_cast %50 : vector<2x1x128xf32> to vector<2x1x128xf32>
    %55 = vector.broadcast %54 : vector<2x1x128xf32> to vector<2x16x128xf32>
    %56 = arith.select %53, %55, %51 : vector<2x16x128xi1>, vector<2x16x128xf32>
    %c15_i32 = arith.constant 15 : i32
    %57 = vector.broadcast %c15_i32 : i32 to vector<1x16x1xi32>
    %58 = arith.cmpi eq, %47, %57 : vector<1x16x1xi32>
    %59 = vector.extract_strided_slice %46 {offsets = [0, 14, 0], sizes = [2, 1, 128], strides = [1, 1, 1]} : vector<2x16x128xf32> to vector<2x1x128xf32>
    %c15_i32_6 = arith.constant 15 : i32
    %60 = tpu.dynamic_rotate %46 by %c15_i32_6 dim 1 : vector<2x16x128xf32>, i32 -> vector<2x16x128xf32>
    %61 = vector.shape_cast %58 : vector<1x16x1xi1> to vector<1x16x1xi1>
    %62 = vector.broadcast %61 : vector<1x16x1xi1> to vector<2x16x128xi1>
    %63 = vector.shape_cast %59 : vector<2x1x128xf32> to vector<2x1x128xf32>
    %64 = vector.broadcast %63 : vector<2x1x128xf32> to vector<2x16x128xf32>
    %65 = arith.select %62, %64, %60 : vector<2x16x128xi1>, vector<2x16x128xf32>
    %66 = arith.addf %56, %35 : vector<2x16x128xf32>
    %67 = arith.addf %66, %65 : vector<2x16x128xf32>
    %c0_7 = arith.constant 0 : index
    %68 = memref.load %arg2[%c0_7] : memref<1xf32, #tpu.memory_space<smem>>
    %69 = vector.broadcast %68 : f32 to vector<2x16x128xf32>
    %70 = arith.addf %67, %69 : vector<2x16x128xf32>
    %71 = math.tanh %70 : vector<2x16x128xf32>
    %c0_8 = arith.constant 0 : index
    %72 = memref.load %arg3[%c0_8] : memref<1xf32, #tpu.memory_space<smem>>
    %73 = vector.broadcast %72 : f32 to vector<2x16x128xf32>
    %74 = arith.mulf %71, %73 : vector<2x16x128xf32>
    %75 = arith.addf %74, %0 : vector<2x16x128xf32>
    %c0_9 = arith.constant 0 : index
    %c0_10 = arith.constant 0 : index
    %c0_11 = arith.constant 0 : index
    %76 = vector.load %arg5[%c0_9, %c0_10, %c0_11] : memref<2x16x128xf32, #tpu.memory_space<vmem>>, vector<2x16x128xf32>
    tpu.vector_store %arg5[%c0_9, %c0_10, %c0_11], %75 {strides = array<i32>} : memref<2x16x128xf32, #tpu.memory_space<vmem>>, vector<2x16x128xf32>,
    return
  }
  func.func @transform_0(%arg0: i32) -> i32 {
    %c0_i32 = arith.constant 0 : i32
    %c0_i32_0 = arith.constant 0 : i32
    return %c0_i32 : i32
  }
  func.func @transform_1(%arg0: i32) -> i32 {
    %c0_i32 = arith.constant 0 : i32
    %c0_i32_0 = arith.constant 0 : i32
    return %c0_i32 : i32
  }
  func.func @transform_2(%arg0: i32) -> i32 {
    %c0_i32 = arith.constant 0 : i32
    %c0_i32_0 = arith.constant 0 : i32
    return %c0_i32 : i32
  }
  func.func @transform_3(%arg0: i32) -> (i32, i32, i32) {
    %c0_i32 = arith.constant 0 : i32
    %c0_i32_0 = arith.constant 0 : i32
    %c0_i32_1 = arith.constant 0 : i32
    return %arg0, %c0_i32, %c0_i32_0 : i32, i32, i32
  }
  func.func @transform_4(%arg0: i32) -> (i32, i32, i32) {
    %c0_i32 = arith.constant 0 : i32
    %c0_i32_0 = arith.constant 0 : i32
    %c0_i32_1 = arith.constant 0 : i32
    return %arg0, %c0_i32, %c0_i32_0 : i32, i32, i32
  }
}

</mosaic_0001>

<bundles_post_ra>
// kernel: tpu_custom_call.1
= control target key start
LH: loop header
LB: loop body
LE: loop exit
PB: predicated region body
PF: predicated region fallthrough
CT: control target
= control target key end

     0   :  { %11 = vsyncpa [#allocation7], 0  ;;  %s589_s0 = inlined_call_operand.hbm [shape: f32[9], index: 0, kind: input, shape index: {}]   ;;  %s590_s1 = inlined_call_operand.<no memory space> [shape: f32[1], index: 1, kind: input, shape index: {}]   ;;  %s591_s2 = inlined_call_operand.<no memory space> [shape: f32[1], index: 2, kind: input, shape index: {}]   ;;  %s592_s3 = inlined_call_operand.hbm [shape: f32[2,16,128], index: 3, kind: input, shape index: {}]   ;;  %s593_s4 = inlined_call_operand.hbm [shape: f32[2,16,128], index: 4, kind: output, shape index: {}]  }
   0x1   :  { %12 = vsyncpa [#allocation5], 0 }
   0x2   :  { %13 = vsyncpa [#allocation6], 0  ;;  %s289_s17 = scalar_lea.hbm %s589_s0, 16 }
   0x3   :  { %p290_p0 = scmp.ne.s32.totalorder %s589_s0, %s289_s17  ;;  %p293_p1 = scmp.lt.u32.totalorder %s289_s17, %s589_s0 }
   0x5   :  { %p295_p2 = pnand %p293_p1, %p290_p0 }
   0x7   :  { %298 = shalt.err (!%p295_p2)
}
   0x8   :  { %s349_s22 = smov [#allocation4]   ;;  %s350_s25 = smov [#allocation8]  }
   0x9   :  { %21 = dma.hbm_to_smem %s589_s0, 16, %s349_s22, [#allocation7]  }
   0xa   :  { %s31_s26 = sshll.u32 %s350_s25, 4  ;;  %s299_s29 = scalar_lea.hbm %s592_s3, 512  ;;  %s32_s26 = int_to_ptr.vmem [resolvable:$true] %s31_s26 }
   0xb   :  { %p300_p3 = scmp.ne.s32.totalorder %s592_s3, %s299_s29  ;;  %p303_p4 = scmp.lt.u32.totalorder %s299_s29, %s592_s3 }
   0xd   :  { %p305_p5 = pnand %p303_p4, %p300_p3 }
   0xf   :  { %308 = shalt.err (!%p305_p5)
}
  0x10   :  { %s309_s8 = scalar_lea.vmem %s32_s26, 512  ;;  %p314_p7 = scmp.lt.s32.totalorder %s32_s26, %s32_s26 }
  0x11   :  { %p310_p6 = scmp.ne.s32.totalorder %s32_s26, %s309_s8  ;;  %p315_p8 = scmp.lt.s32.totalorder %s309_s8, %s309_s8 }
  0x13   :  { %p316_p9 = por %p315_p8, %p314_p7 }
  0x15   :  { %p317_p10 = pnand %p316_p9, %p310_p6 }
  0x17   :  { %320 = shalt.err (!%p317_p10)
}
  0x18   :  { %s351_s0 = smov 128   ;;  %s352_s9 = smov 8  }
  0x19   :  { %37 = dma.hbm_to_vmem [thread:$0]  %s592_s3, 512, %s32_s26, [#allocation5], %s351_s0, %s351_s0, %s352_s9  }
  0x1a   :  { %343 = dma.done.wait [#allocation7], 16  }
  0x1b   :  { %344 = vsyncadd [#allocation7], 4294967280 }
  0x1c   :  { %345 = dma.done.wait [#allocation5], 512  }
  0x1d   :  { %346 = vsyncadd [#allocation5], 4294966784 }
  0x1e   :  { %44 = sfence }
  0x1f   :  { %v408_v0 = vld [vmem:[#allocation8 + $0x10] sm:$0xff]  ;;  %v410_v1 = vld [vmem:[#allocation8] sm:$0xff]  ;;  %s353_s12 = smov 1   ;;  %v414_v2 = vld [vmem:[#allocation8 + $0x18] sm:$0xff]  ;;  %s354_s3 = smov 127   ;;  %v49_v4 = vlaneseq  ;;  %v438_v13 = vstv %s590_s1 }
  0x20   :  { %57 = vrot.lane.b32.xlu1 %v408_v0, %s353_s12  ;;  %53 = vrot.lane.b32.xlu0 %v410_v1, %s353_s12  ;;  %v416_v3 = vld [vmem:[#allocation8 + $0x8] sm:$0xff]  ;;  %s266_s13 = sld [smem:[#allocation4 + $0x1]]  ;;  %s81_s14 = sld [smem:[#allocation4]] }
  0x21   :  { %s269_s15 = sld [smem:[#allocation4 + $0x4]]  ;;  %s272_s16 = sld [smem:[#allocation4 + $0x7]]  ;;  %v426_v7 = vand.u32 127, %v49_v4  ;;  %v428_v8 = vshrl.u32 %v49_v4, 7 }
  0x22   :  { %s267_s17 = sld [smem:[#allocation4 + $0x2]]  ;;  %s268_s18 = sld [smem:[#allocation4 + $0x3]] }
  0x23   :  { %s270_s19 = sld [smem:[#allocation4 + $0x5]]  ;;  %s271_s20 = sld [smem:[#allocation4 + $0x6]]  ;;  %vm51_vm0 = vcmp.eq.s32.totalorder %v426_v7, 0  ;;  %vm52_vm1 = vcmp.eq.s32.totalorder %v426_v7, 127  ;;  %v206_v12 = vsub.s32 6, %v428_v8  ;;  %v445_v16 = vadd.s32 8, %v428_v8 }
  0x24   :  { %59 = vrot.lane.b32.xlu1 %v414_v2, %s353_s12  ;;  %55 = vrot.lane.b32.xlu0 %v416_v3, %s353_s12  ;;  %s273_s21 = sld [smem:[#allocation4 + $0x8]]  ;;  %v179_v17 = vsub.s32 1, %v428_v8  ;;  %vm168_vm2 = vcmp.lt.s32.totalorder %v428_v8, 1  ;;  %vm162_vm3 = vcmp.eq.s32.totalorder %v428_v8, 0  ;;  %vm195_vm4 = vcmp.lt.s32.totalorder %v428_v8, 7 }
  0x25   :  { %vm190_vm5 = vcmp.eq.s32.totalorder %v445_v16, 15 }
  0x26   :  { %v88_v9 = vstv %s266_s13  ;;  %v448_v18 = vstv %s81_s14 }
  0x27   :  { %v440_v14 = vstv %s269_s15  ;;  %v442_v15 = vstv %s272_s16  ;;  %v90_v21 = vmul.f32 %v88_v9, %v416_v3  ;;  %v89_v23 = vmul.f32 %v88_v9, %v410_v1 }
  0x28   :  { %63 = vrot.lane.b32.xlu1 %v416_v3, %s354_s3  ;;  %61 = vrot.lane.b32.xlu0 %v410_v1, %s354_s3  ;;  %v450_v19 = vstv %s267_s17  ;;  %v452_v20 = vstv %s268_s18  ;;  %v92_v24 = vmul.f32 %v88_v9, %v414_v2  ;;  %v460_v25 = vmul.f32 %v88_v9, %v408_v0 }
  0x29   :  { %v455_v22 = vstv %s270_s19  ;;  %v462_v26 = vstv %s271_s20  ;;  %v116_v29 = vmul.f32 %v440_v14, %v416_v3  ;;  %v142_v30 = vmul.f32 %v442_v15, %v416_v3 }
  0x2a   :  { %v464_v27 = vstv %s273_s21  ;;  %v115_v38 = vmul.f32 %v440_v14, %v410_v1  ;;  %v141_v39 = vmul.f32 %v442_v15, %v410_v1  ;;  %v118_v43 = vmul.f32 %v440_v14, %v414_v2 }
  0x2b   :  { %v144_v63 = vmul.f32 %v442_v15, %v414_v2 }
  0x2c   :  { %67 = vrot.lane.b32.xlu1 %v414_v2, %s354_s3  ;;  %65 = vrot.lane.b32.xlu0 %v408_v0, %s354_s3 }
  0x92   :  { %v424_v5 = vpop.permute.xlu1 %57  ;;  %v54_v6 = vpop.permute.xlu0 %53 }
  0x96   :  { %v430_v10 = vpop.permute.xlu1 %59  ;;  %v56_v11 = vpop.permute.xlu0 %55 }
  0x9a   :  { %v64_v28 = vpop.permute.xlu1 %63  ;;  %v62_v31 = vpop.permute.xlu0 %61 }
  0x9b   :  { %v72_v32 = vsel %vm51_vm0, %v64_v28, %v56_v11  ;;  %v78_v33 = vsel %vm52_vm1, %v56_v11, %v64_v28  ;;  %v71_v34 = vsel %vm51_vm0, %v62_v31, %v54_v6  ;;  %v77_v35 = vsel %vm52_vm1, %v54_v6, %v62_v31 }
  0x9c   :  { %v84_v36 = vmul.f32 %v448_v18, %v72_v32  ;;  %v110_v37 = vmul.f32 %v452_v20, %v72_v32  ;;  %v100_v40 = vmul.f32 %v450_v19, %v78_v33  ;;  %v136_v41 = vmul.f32 %v462_v26, %v72_v32 }
  0x9d   :  { %v83_v42 = vmul.f32 %v448_v18, %v71_v34  ;;  %v152_v45 = vmul.f32 %v464_v27, %v78_v33  ;;  %v99_v46 = vmul.f32 %v450_v19, %v77_v35  ;;  %v109_v47 = vmul.f32 %v452_v20, %v71_v34 }
  0x9e   :  { %v94_v44 = vadd.f32 %v90_v21, %v84_v36  ;;  %v68_v48 = vpop.permute.xlu1 %67  ;;  %v120_v49 = vadd.f32 %v116_v29, %v110_v37  ;;  %v146_v50 = vadd.f32 %v142_v30, %v136_v41  ;;  %v135_v52 = vmul.f32 %v462_v26, %v71_v34 }
  0x9f   :  { %v93_v51 = vadd.f32 %v89_v23, %v83_v42  ;;  %v126_v54 = vmul.f32 %v455_v22, %v78_v33  ;;  %v119_v55 = vadd.f32 %v115_v38, %v109_v47  ;;  %v74_v56 = vsel %vm51_vm0, %v68_v48, %v430_v10 }
  0xa0   :  { %v104_v53 = vadd.f32 %v100_v40, %v94_v44  ;;  %v156_v57 = vadd.f32 %v152_v45, %v146_v50  ;;  %v145_v59 = vadd.f32 %v141_v39, %v135_v52  ;;  %v151_v60 = vmul.f32 %v464_v27, %v77_v35  ;;  %v66_v39 = vpop.permute.xlu0 %65 }
  0xa1   :  { %v103_v58 = vadd.f32 %v99_v46, %v93_v51  ;;  %v125_v62 = vmul.f32 %v455_v22, %v77_v35  ;;  %v86_v4 = vmul.f32 %v448_v18, %v74_v56  ;;  %v130_v6 = vadd.f32 %v126_v54, %v120_v49 }
  0xa2   :  { %v166_v61 = vrot.slane %v104_v53, 7  ;;  %v193_v9 = vrot.slane %v156_v57, 1  ;;  %v155_v11 = vadd.f32 %v151_v60, %v145_v59  ;;  %v207_v23 = vrot.slane %v156_v57, %v206_v12 }
  0xa3   :  { %v164_v21 = vrot.slane %v103_v58, 7  ;;  %v129_v28 = vadd.f32 %v125_v62, %v119_v55  ;;  %v180_v29 = vrot.slane %v103_v58, %v179_v17  ;;  %v80_v30 = vsel %vm52_vm1, %v430_v10, %v68_v48 }
  0xa4   :  { %v191_v33 = vrot.slane %v155_v11, 1  ;;  %v138_v34 = vmul.f32 %v462_v26, %v74_v56  ;;  %v96_v37 = vadd.f32 %v92_v24, %v86_v4  ;;  %v143_v38 = vmul.f32 %v442_v15, %v408_v0 }
  0xa5   :  { %v169_v31 = vsel %vm168_vm2, %v164_v21, %v166_v61  ;;  %v171_v32 = vsel %vm168_vm2, %v166_v61, %v164_v21  ;;  %v102_v41 = vmul.f32 %v450_v19, %v80_v30  ;;  %v112_v46 = vmul.f32 %v452_v20, %v74_v56 }
  0xa6   :  { %v185_v35 = vsel %vm162_vm3, %v180_v29, %v171_v32  ;;  %v217_v36 = vadd.f32 %v169_v31, %v130_v6  ;;  %v198_v10 = vsel %vm195_vm4, %v193_v9, %v191_v33  ;;  %v148_v42 = vadd.f32 %v144_v63, %v138_v34 }
  0xa7   :  { %v216_v40 = vadd.f32 %v185_v35, %v129_v28  ;;  %v196_v44 = vsel %vm195_vm4, %v191_v33, %v193_v9  ;;  %v213_v45 = vsel %vm190_vm5, %v207_v23, %v198_v10  ;;  %v154_v24 = vmul.f32 %v464_v27, %v80_v30 }
  0xa8   :  { %v221_v15 = vadd.f32 %v217_v36, %v213_v45  ;;  %v73_v48 = vsel %vm51_vm0, %v66_v39, %v424_v5  ;;  %v79_v49 = vsel %vm52_vm1, %v424_v5, %v66_v39  ;;  %v106_v50 = vadd.f32 %v102_v41, %v96_v37 }
  0xa9   :  { %v220_v47 = vadd.f32 %v216_v40, %v196_v44  ;;  %v117_v51 = vmul.f32 %v440_v14, %v408_v0  ;;  %v85_v52 = vmul.f32 %v448_v18, %v73_v48  ;;  %v111_v53 = vmul.f32 %v452_v20, %v73_v48 }
  0xaa   :  { %v227_v55 = vadd.f32 %v438_v13, %v221_v15  ;;  %v158_v56 = vadd.f32 %v154_v24, %v148_v42  ;;  %v137_v57 = vmul.f32 %v462_v26, %v73_v48  ;;  %v101_v7 = vmul.f32 %v450_v19, %v79_v49 }
  0xab   :  { %v226_v54 = vadd.f32 %v438_v13, %v220_v47  ;;  %v95_v58 = vadd.f32 %v460_v25, %v85_v52  ;;  %v122_v5 = vadd.f32 %v118_v43, %v112_v46  ;;  %v153_v14 = vmul.f32 %v464_v27, %v79_v49 }
  0xac   :  { %v147_v59 = vadd.f32 %v143_v38, %v137_v57  ;;  %v167_v18 = vrot.slane %v106_v50, 7  ;;  %v121_v20 = vadd.f32 %v117_v51, %v111_v53  ;;  %v128_v61 = vmul.f32 %v455_v22, %v80_v30 }
  0xad   :  { %281 = vtanh.f32 %v226_v54  ;;  %v105_v60 = vadd.f32 %v101_v7, %v95_v58  ;;  %v194_v62 = vrot.slane %v158_v56, 1  ;;  %v211_v26 = vrot.slane %v158_v56, %v206_v12 }
  0xae   :  { %283 = vtanh.f32 %v227_v55  ;;  %v157_v63 = vadd.f32 %v153_v14, %v147_v59  ;;  %v127_v25 = vmul.f32 %v455_v22, %v79_v49  ;;  %v132_v43 = vadd.f32 %v128_v61, %v122_v5 }
  0xaf   :  { %v165_v4 = vrot.slane %v105_v60, 7  ;;  %v184_v19 = vrot.slane %v105_v60, %v179_v17  ;;  %v235_v30 = vstv %s591_s2  ;;  %s355_s2 = smov [#allocation9]  }
  0xb0   :  { %v192_v6 = vrot.slane %v157_v63, 1  ;;  %v131_v27 = vadd.f32 %v127_v25, %v121_v20  ;;  %s253_s25 = sshll.u32 %s355_s2, 4  ;;  %s254_s25 = int_to_ptr.vmem [resolvable:$true] %s253_s25 }
  0xb1   :  { %v170_v9 = vsel %vm168_vm2, %v165_v4, %v167_v18  ;;  %v172_v11 = vsel %vm168_vm2, %v167_v18, %v165_v4  ;;  %s321_s26 = scalar_lea.vmem %s254_s25, 512  ;;  %p326_p12 = scmp.lt.s32.totalorder %s254_s25, %s254_s25 }
  0xb2   :  { %v187_v21 = vsel %vm162_vm3, %v184_v19, %v172_v11  ;;  %v199_v12 = vsel %vm195_vm4, %v194_v62, %v192_v6  ;;  %v219_v22 = vadd.f32 %v170_v9, %v132_v43  ;;  %v197_v28 = vsel %vm195_vm4, %v192_v6, %v194_v62  ;;  %p322_p11 = scmp.ne.s32.totalorder %s254_s25, %s321_s26  ;;  %p327_p13 = scmp.lt.s32.totalorder %s321_s26, %s321_s26 }
  0xb3   :  { %v215_v23 = vsel %vm190_vm5, %v211_v26, %v199_v12  ;;  %v218_v17 = vadd.f32 %v187_v21, %v131_v27 }
  0xb4   :  { %v223_v29 = vadd.f32 %v219_v22, %v215_v23  ;;  %p328_p0 = por %p327_p13, %p326_p12 }
  0xb5   :  { %v222_v31 = vadd.f32 %v218_v17, %v197_v28 }
  0xb6   :  { %v229_v33 = vadd.f32 %v438_v13, %v223_v29  ;;  %p329_p1 = pnand %p328_p0, %p322_p11 }
  0xb7   :  { %v282_v32 = vpop.eup %281  ;;  %v228_v35 = vadd.f32 %v438_v13, %v222_v31 }
  0xb8   :  { %v284_v34 = vpop.eup %283  ;;  %v236_v36 = vmul.f32 %v282_v32, %v235_v30  ;;  %285 = vtanh.f32 %v229_v33 }
  0xb9   :  { %v237_v16 = vmul.f32 %v284_v34, %v235_v30  ;;  %287 = vtanh.f32 %v228_v35 }
  0xba   :  { %v240_v37 = vadd.f32 %v236_v36, %v410_v1 }
  0xbb   :  { %v241_v8 = vadd.f32 %v237_v16, %v416_v3 }
  0xbc   :  { %244 = vst [vmem:[#allocation9] sm:$0xff] %v240_v37 }
  0xbd   :  { %245 = vst [vmem:[#allocation9 + $0x8] sm:$0xff] %v241_v8 }
  0xc2   :  { %v286_v38 = vpop.eup %285 }
  0xc3   :  { %v288_v39 = vpop.eup %287  ;;  %v239_v10 = vmul.f32 %v286_v38, %v235_v30 }
  0xc4   :  { %v238_v40 = vmul.f32 %v288_v39, %v235_v30 }
  0xc5   :  { %v243_v41 = vadd.f32 %v239_v10, %v414_v2 }
  0xc6   :  { %v242_v13 = vadd.f32 %v238_v40, %v408_v0 }
  0xc7   :  { %247 = vst [vmem:[#allocation9 + $0x18] sm:$0xff] %v243_v41 }
  0xc8   :  { %246 = vst [vmem:[#allocation9 + $0x10] sm:$0xff] %v242_v13 }
  0xc9   :  { %332 = shalt.err (!%p329_p1)
}
  0xca   :  { %s333_s29 = scalar_lea.hbm %s593_s4, 512 }
  0xcb   :  { %p334_p2 = scmp.ne.s32.totalorder %s593_s4, %s333_s29  ;;  %p337_p3 = scmp.lt.u32.totalorder %s333_s29, %s593_s4 }
  0xcd   :  { %p339_p4 = pnand %p337_p3, %p334_p2 }
  0xcf   :  { %342 = shalt.err (!%p339_p4)
}
  0xd0   :  { %259 = dma.vmem_to_hbm [thread:$0]  %s254_s25, 512, %s593_s4, [#allocation6], %s351_s0, %s351_s0, %s352_s9  }
  0xd1   :  { %347 = dma.done.wait [#allocation6], 512  }
  0xd2   :  { %348 = vsyncadd [#allocation6], 4294966784 }
  0xd3   :  { %263 = vsyncpa [#allocation5], 1 }
  0xd4   :  { %264 = vsyncpa [#allocation6], 1 }
  0xd5   :  { %265 = vsyncpa [#allocation7], 1 }

</bundles_post_ra>
